<compile_context>
chip_gen: v5e
topology: v5e:2x2
jax: 0.10.0
libtpu: 0.0.40
codegen_flags: <defaults>
</compile_context>

<pallas_src>
import functools
import math

import jax
import jax.numpy as jnp
from jax import lax
from jax.experimental import pallas as pl
from jax.experimental.pallas import tpu as pltpu


def _round_up(x, m):
    return ((x + m - 1) // m) * m


# ---------------------------------------------------------------------------
# Block-size selection (VMEM-budgeted, megacore-aware)
# ---------------------------------------------------------------------------
def _estimate_vmem_bytes(block_bs, seq, d_model, seg, act_bytes, cd_bytes,
                         out_bytes, num_act_inputs):
    rows = block_bs * seq
    acts = num_act_inputs * rows * d_model * act_bytes * 2        # double-buffered inputs
    outs = rows * d_model * out_bytes * 2                         # double-buffered output
    qkv = rows * 3 * seg * (4 + cd_bytes)                         # f32 result + cd copy
    scores = block_bs * seq * seq * 4 * 3                         # scores / exp / probs
    attn = rows * d_model * (4 + cd_bytes)
    weights = (d_model * 3 * seg + d_model * d_model) * cd_bytes * 2 \
              + (3 * seg + d_model) * 4 * 2
    return acts + outs + qkv + scores + attn + weights


def _pick_block_bs(bs, seq, row_align, fits_fn):
    """Largest divisor of bs with sublane-aligned rows that fits the VMEM budget."""
    legal = [d for d in range(1, bs + 1)
             if bs % d == 0 and ((d * seq) % row_align == 0 or d == bs)]
    legal.sort(reverse=True)                       # descending rows
    fitting = [d for d in legal if fits_fn(d)]
    if not fitting:
        return legal[-1]                           # smallest legal block
    best = fitting[0]
    if bs // best == 1:
        # Prefer >=2 grid steps (v7x has 2 TensorCores) if a >=256-row block exists.
        for d in fitting:
            if bs // d >= 2 and d * seq >= 256:
                return d
    return best


# ---------------------------------------------------------------------------
# Kernel bodies
# ---------------------------------------------------------------------------
def _attention_core(qp, kp, vp, w_o, b_o, out_ref, *, seq, d_model, block_bs,
                    approx_recip):
    """Batched scaled-dot-product attention + output projection.

    qp / kp / vp: (block_bs * seq, d_model) in compute dtype.
    """
    rows = block_bs * seq
    scale = 1.0 / math.sqrt(d_model)               # d_k == d_model in this module

    q3 = qp.reshape(block_bs, seq, d_model)
    k3 = kp.reshape(block_bs, seq, d_model)
    v3 = vp.reshape(block_bs, seq, d_model)

    # scores[b, i, j] = sum_d q3[b, i, d] * k3[b, j, d]  (no transpose materialized)
    scores = lax.dot_general(q3, k3, (((2,), (2,)), ((0,), (0,))),
                             preferred_element_type=jnp.float32) * scale

    # Numerically-stable softmax kept in f32; reciprocal goes to the EUP slot.
    m = jnp.max(scores, axis=-1, keepdims=True)
    e = jnp.exp(scores - m)
    denom = jnp.sum(e, axis=-1, keepdims=True)
    probs = e * pl.reciprocal(denom, approx=approx_recip)

    attn = lax.dot_general(probs.astype(v3.dtype), v3,
                           (((2,), (1,)), ((0,), (0,))),
                           preferred_element_type=jnp.float32)

    # Output projection (weight already stored [in, out]; no transpose).
    attn2 = attn.reshape(rows, d_model).astype(w_o.dtype)
    out = jnp.dot(attn2, w_o, preferred_element_type=jnp.float32) + b_o
    out_ref[...] = out.astype(out_ref.dtype)


def _self_attn_kernel(x_ref, wqkv_ref, bqkv_ref, wo_ref, bo_ref, out_ref, *,
                      seq, d_model, block_bs, seg, compute_dtype, approx_recip):
    """q = v = k: a single fused (rows, D) x (D, 3*seg) projection matmul."""
    cd = compute_dtype
    x = x_ref[...].astype(cd)                                        # (rows, D)
    qkv = jnp.dot(x, wqkv_ref[...], preferred_element_type=jnp.float32)
    qkv = (qkv + bqkv_ref[...]).astype(cd)       # cast once after f32 bias add
    qp = qkv[:, 0:d_model]                       # 128-lane-aligned static slices
    kp = qkv[:, seg:seg + d_model]
    vp = qkv[:, 2 * seg:2 * seg + d_model]
    _attention_core(qp, kp, vp, wo_ref[...], bo_ref[...], out_ref,
                    seq=seq, d_model=d_model, block_bs=block_bs,
                    approx_recip=approx_recip)


def _general_attn_kernel(q_ref, v_ref, k_ref, wqkv_ref, bqkv_ref, wo_ref, bo_ref,
                         out_ref, *, seq, d_model, block_bs, seg, compute_dtype,
                         approx_recip):
    """Distinct q / v / k inputs: three matmuls against lane-aligned weight slices."""
    cd = compute_dtype
    w = wqkv_ref[...]
    bias = bqkv_ref[...]

    def proj(ref, s):
        y = jnp.dot(ref[...].astype(cd), w[:, s:s + d_model],
                    preferred_element_type=jnp.float32) + bias[:, s:s + d_model]
        return y.astype(cd)                      # single cast per projection

    qp = proj(q_ref, 0)
    kp = proj(k_ref, seg)
    vp = proj(v_ref, 2 * seg)
    _attention_core(qp, kp, vp, wo_ref[...], bo_ref[...], out_ref,
                    seq=seq, d_model=d_model, block_bs=block_bs,
                    approx_recip=approx_recip)


# ---------------------------------------------------------------------------
# Parameter packing (call once, reuse across forward calls)
# ---------------------------------------------------------------------------
def pack_params(params, compute_dtype=jnp.bfloat16):
    """PyTorch W[out,in] / b[out] -> pre-transposed, fused, lane-aligned slabs."""
    d_model = jnp.asarray(params["wq"]).shape[0]
    seg = _round_up(d_model, 128)
    pad_c = seg - d_model

    def t(w):                                     # (out,in) -> (in,out), compute dtype
        w = jnp.asarray(w).T.astype(compute_dtype)
        return jnp.pad(w, ((0, 0), (0, pad_c))) if pad_c else w

    def b(bv):
        bv = jnp.asarray(bv, jnp.float32)
        return jnp.pad(bv, (0, pad_c)) if pad_c else bv

    w_qkv = jnp.concatenate([t(params["wq"]), t(params["wk"]), t(params["wv"])],
                            axis=1)               # (D, 3*seg)
    b_qkv = jnp.concatenate([b(params["bq"]), b(params["bk"]),
                             b(params["bv"])]).reshape(1, 3 * seg)
    w_o = jnp.asarray(params["wo"]).T.astype(compute_dtype)
    b_o = jnp.asarray(params["bo"], jnp.float32).reshape(1, d_model)
    return dict(w_qkv=w_qkv, b_qkv=b_qkv, w_o=w_o, b_o=b_o)


# ---------------------------------------------------------------------------
# Wrapper
# ---------------------------------------------------------------------------
def attn_network_forward(q, v, k, params, *, compute_dtype=jnp.bfloat16,
                         block_bs=None, vmem_budget_bytes=20 * 1024 * 1024):
    """Pallas implementation of Attn_Network.forward(q, v, k) (eval mode).

    `params` may be the raw PyTorch-layout dict or the result of pack_params().
    """
    bs, seq, d_model = q.shape
    if isinstance(params, dict) and "w_qkv" in params:
        packed = params
    else:
        packed = pack_params(params, compute_dtype=compute_dtype)
    cd = jnp.dtype(packed["w_qkv"].dtype)
    seg = packed["w_qkv"].shape[1] // 3
    assert packed["w_qkv"].shape[0] == d_model

    # NOTE: the fused-QKV fast path is gated on object identity (the usual
    # self-attention call `forward(x, x, x)`); numerically identical but
    # distinct tensors take the (correct) general 3-projection path.
    self_attention = (q is v) and (q is k)
    num_act_inputs = 1 if self_attention else 3

    # bf16 activation I/O when computing in bf16 (halves HBM->VMEM DMA bytes).
    act_dtype = jnp.dtype(jnp.bfloat16) if cd == jnp.bfloat16 else jnp.dtype(q.dtype)
    row_align = 16 if act_dtype.itemsize == 2 else 8
    out_dtype = jnp.dtype(q.dtype)

    def fits(d):
        return _estimate_vmem_bytes(
            d, seq, d_model, seg, act_dtype.itemsize, cd.itemsize,
            out_dtype.itemsize, num_act_inputs) <= vmem_budget_bytes

    if block_bs is None:
        block_bs = _pick_block_bs(bs, seq, row_align, fits)
    if bs % block_bs != 0:
        raise ValueError(f"block_bs={block_bs} must divide bs={bs}")
    rows = block_bs * seq

    static = dict(seq=seq, d_model=d_model, block_bs=block_bs, seg=seg,
                  compute_dtype=cd, approx_recip=bool(cd != jnp.float32))

    # Flatten (bs, seq, D) -> (bs*seq, D): projections become one big matmul per
    # grid step and the output store is lane-dense whenever d_model >= 128.
    q2 = q.reshape(bs * seq, d_model).astype(act_dtype)
    if self_attention:
        kernel = functools.partial(_self_attn_kernel, **static)
        inputs = (q2, packed["w_qkv"], packed["b_qkv"], packed["w_o"], packed["b_o"])
    else:
        kernel = functools.partial(_general_attn_kernel, **static)
        v2 = v.reshape(bs * seq, d_model).astype(act_dtype)
        k2 = k.reshape(bs * seq, d_model).astype(act_dtype)
        inputs = (q2, v2, k2, packed["w_qkv"], packed["b_qkv"],
                  packed["w_o"], packed["b_o"])

    act_spec = pl.BlockSpec((rows, d_model), lambda i: (i, 0))

    def run(single_buffer_weights):
        pm = dict(pipeline_mode=pl.Buffered(1)) if single_buffer_weights else {}
        wqkv_spec = pl.BlockSpec((d_model, 3 * seg), lambda i: (0, 0), **pm)
        bqkv_spec = pl.BlockSpec((1, 3 * seg), lambda i: (0, 0), **pm)
        wo_spec = pl.BlockSpec((d_model, d_model), lambda i: (0, 0), **pm)
        bo_spec = pl.BlockSpec((1, d_model), lambda i: (0, 0), **pm)
        if self_attention:
            in_specs = [act_spec, wqkv_spec, bqkv_spec, wo_spec, bo_spec]
        else:
            in_specs = [act_spec, act_spec, act_spec,
                        wqkv_spec, bqkv_spec, wo_spec, bo_spec]
        return pl.pallas_call(
            kernel,
            out_shape=jax.ShapeDtypeStruct((bs * seq, d_model), out_dtype),
            grid_spec=pltpu.PrefetchScalarGridSpec(
                num_scalar_prefetch=0,
                grid=(bs // block_bs,),
                in_specs=in_specs,
                out_specs=act_spec,
            ),
            compiler_params=pltpu.CompilerParams(
                dimension_semantics=("parallel",),
                vmem_limit_bytes=32 * 1024 * 1024,
            ),
        )(*inputs)

    try:
        out2 = run(single_buffer_weights=True)
    except Exception:
        # TODO(synk): pl.Buffered(1) single-buffering rejected by this JAX build;
        # fall back to default double-buffered weight blocks (VMEM-only cost).
        out2 = run(single_buffer_weights=False)

    return out2.reshape(bs, seq, d_model)


# ---------------------------------------------------------------------------
# Parameters / reference / demo
# ---------------------------------------------------------------------------
def init_params(key, d_model, dtype=jnp.float32):
    """Synthetic parameters in PyTorch Linear layout: W[out, in], b[out]."""
    keys = jax.random.split(key, 8)
    bound = 1.0 / math.sqrt(d_model)

    def lin(kw, kb):
        w = jax.random.uniform(kw, (d_model, d_model), dtype, -bound, bound)
        b = jax.random.uniform(kb, (d_model,), dtype, -bound, bound)
        return w, b

    wq, bq = lin(keys[0], keys[1])
    wk, bk = lin(keys[2], keys[3])
    wv, bv = lin(keys[4], keys[5])
    wo, bo = lin(keys[6], keys[7])
    return dict(wq=wq, bq=bq, wk=wk, bk=bk, wv=wv, bv=bv, wo=wo, bo=bo)


def _reference(q, v, k, p):
    """Pure-JAX f32 reference mirroring the PyTorch forward (eval mode)."""
    d_model = q.shape[-1]
    qp = q @ p["wq"].T + p["bq"]
    kp = k @ p["wk"].T + p["bk"]
    vp = v @ p["wv"].T + p["bv"]
    scores = jnp.einsum("bsd,btd->bst", qp, kp) / math.sqrt(d_model)
    probs = jax.nn.softmax(scores, axis=-1)
    attn = jnp.einsum("bst,btd->bsd", probs, vp)
    return attn @ p["wo"].T + p["bo"]


if __name__ == "__main__":
    bs, seq, d_model = 2, 8, 128  # d_model = 128 keeps stores lane-dense
    key = jax.random.PRNGKey(0)
    kx, kq, kv, kk, kp = jax.random.split(key, 5)
    params = init_params(kp, d_model)
    packed_bf16 = pack_params(params, compute_dtype=jnp.bfloat16)  # pack once, reuse

    # 1) Self-attention call (q = v = k): exercises the fused-QKV kernel path.
    x = jax.random.normal(kx, (bs, seq, d_model), jnp.float32)
    out_self = jax.block_until_ready(attn_network_forward(x, x, x, packed_bf16))
    ref_self = _reference(x, x, x, params)
    assert out_self.shape == (bs, seq, d_model)
    assert jnp.allclose(out_self, ref_self, atol=5e-2, rtol=5e-2), \
        "self-attention (bf16) mismatch vs reference"

    # 2) Distinct q / v / k: exercises the general kernel path (bf16 I/O).
    q = jax.random.normal(kq, (bs, seq, d_model), jnp.float32)
    v = jax.random.normal(kv, (bs, seq, d_model), jnp.float32)
    k = jax.random.normal(kk, (bs, seq, d_model), jnp.float32)
    out_bf16 = jax.block_until_ready(attn_network_forward(q, v, k, packed_bf16))
    ref = _reference(q, v, k, params)
    assert out_bf16.shape == (bs, seq, d_model)
    assert jnp.allclose(out_bf16, ref, atol=5e-2, rtol=5e-2), \
        "general attention (bf16) mismatch vs reference"

    # 3) Full-f32 compute path (exact reciprocal): near-exact match.
    out_f32 = jax.block_until_ready(
        attn_network_forward(q, v, k, params, compute_dtype=jnp.float32))
    assert jnp.allclose(out_f32, ref, atol=5e-3, rtol=5e-3), \
        "general attention (f32) mismatch vs reference"

    print("KERNEL_OK")
</pallas_src>

<mosaic_0001>
module attributes {stable_mosaic.version = 11 : i64} {
  func.func @_self_attn_kernel(%arg0: i32, %arg1: memref<16x128xbf16, #tpu.memory_space<vmem>>, %arg2: memref<128x384xbf16, #tpu.memory_space<vmem>>, %arg3: memref<1x384xf32, #tpu.memory_space<vmem>>, %arg4: memref<128x128xbf16, #tpu.memory_space<vmem>>, %arg5: memref<1x128xf32, #tpu.memory_space<vmem>>, %arg6: memref<16x128xf32, #tpu.memory_space<vmem>>) attributes {dimension_semantics = [#tpu.dimension_semantics<parallel>], iteration_bounds = array<i64: 1>, scalar_prefetch = 0 : i64, scratch_operands = 0 : i64, tpu.core_type = #tpu.core_type<tc>, window_params = [{transform_indices = @transform_0, window_bounds = array<i64: 16, 128>}, {pipeline_mode = #tpu.pipeline_mode<synchronous>, transform_indices = @transform_1, window_bounds = array<i64: 128, 384>}, {pipeline_mode = #tpu.pipeline_mode<synchronous>, transform_indices = @transform_2, window_bounds = array<i64: 1, 384>}, {pipeline_mode = #tpu.pipeline_mode<synchronous>, transform_indices = @transform_3, window_bounds = array<i64: 128, 128>}, {pipeline_mode = #tpu.pipeline_mode<synchronous>, transform_indices = @transform_4, window_bounds = array<i64: 1, 128>}, {transform_indices = @transform_5, window_bounds = array<i64: 16, 128>}]} {
    %c0 = arith.constant 0 : index
    %c0_0 = arith.constant 0 : index
    %0 = vector.load %arg1[%c0, %c0_0] : memref<16x128xbf16, #tpu.memory_space<vmem>>, vector<16x128xbf16>
    %c0_1 = arith.constant 0 : index
    %c0_2 = arith.constant 0 : index
    %1 = vector.load %arg2[%c0_1, %c0_2] : memref<128x384xbf16, #tpu.memory_space<vmem>>, vector<128x384xbf16>
    %cst = arith.constant dense<0.000000e+00> : vector<16x384xf32>
    %2 = tpu.matmul %0, %1, %cst {dimension_numbers = #tpu.dot_dimension_numbers<[1], [0], [0], [1], [0, 0, 1, 1], [], []>} : vector<16x128xbf16>, vector<128x384xbf16>, vector<16x384xf32> -> vector<16x384xf32>
    %c0_3 = arith.constant 0 : index
    %c0_4 = arith.constant 0 : index
    %3 = vector.load %arg3[%c0_3, %c0_4] : memref<1x384xf32, #tpu.memory_space<vmem>>, vector<1x384xf32>
    %4 = vector.broadcast %3 : vector<1x384xf32> to vector<16x384xf32>
    %5 = arith.addf %2, %4 : vector<16x384xf32>
    %6 = arith.truncf %5 : vector<16x384xf32> to vector<16x384xbf16>
    %7 = vector.extract_strided_slice %6 {offsets = [0, 0], sizes = [16, 128], strides = [1, 1]} : vector<16x384xbf16> to vector<16x128xbf16>
    %8 = vector.extract_strided_slice %6 {offsets = [0, 128], sizes = [16, 128], strides = [1, 1]} : vector<16x384xbf16> to vector<16x128xbf16>
    %9 = vector.extract_strided_slice %6 {offsets = [0, 256], sizes = [16, 128], strides = [1, 1]} : vector<16x384xbf16> to vector<16x128xbf16>
    %c0_5 = arith.constant 0 : index
    %c0_6 = arith.constant 0 : index
    %10 = vector.load %arg4[%c0_5, %c0_6] : memref<128x128xbf16, #tpu.memory_space<vmem>>, vector<128x128xbf16>
    %c0_7 = arith.constant 0 : index
    %c0_8 = arith.constant 0 : index
    %11 = vector.load %arg5[%c0_7, %c0_8] : memref<1x128xf32, #tpu.memory_space<vmem>>, vector<1x128xf32>
    %12 = vector.shape_cast %7 : vector<16x128xbf16> to vector<2x8x128xbf16>
    %13 = vector.shape_cast %8 : vector<16x128xbf16> to vector<2x8x128xbf16>
    %14 = vector.shape_cast %9 : vector<16x128xbf16> to vector<2x8x128xbf16>
    %cst_9 = arith.constant dense<0.000000e+00> : vector<2x8x8xf32>
    %15 = tpu.matmul %12, %13, %cst_9 {dimension_numbers = #tpu.dot_dimension_numbers<[2], [2], [1], [1], [0, 0, 0, 1, 1, 1], [0], [0]>} : vector<2x8x128xbf16>, vector<2x8x128xbf16>, vector<2x8x8xf32> -> vector<2x8x8xf32>
    %cst_10 = arith.constant 0.0883883461 : f32
    %16 = vector.broadcast %cst_10 : f32 to vector<2x8x8xf32>
    %17 = arith.mulf %15, %16 : vector<2x8x8xf32>
    %cst_11 = arith.constant dense<0xFF800000> : vector<2x8xf32>
    %18 = vector.multi_reduction <maximumf>, %17, %cst_11 [2] : vector<2x8x8xf32> to vector<2x8xf32>
    %19 = vector.shape_cast %18 : vector<2x8xf32> to vector<2x8x1xf32>
    %20 = vector.broadcast %19 : vector<2x8x1xf32> to vector<2x8x8xf32>
    %21 = arith.subf %17, %20 : vector<2x8x8xf32>
    %22 = math.exp %21 : vector<2x8x8xf32>
    %cst_12 = arith.constant dense<0.000000e+00> : vector<2x8xf32>
    %23 = vector.multi_reduction <add>, %22, %cst_12 [2] : vector<2x8x8xf32> to vector<2x8xf32>
    %24 = vector.shape_cast %23 : vector<2x8xf32> to vector<2x8x1xf32>
    %25 = tpu.reciprocal %24 {approx = true} : vector<2x8x1xf32> -> vector<2x8x1xf32>
    %26 = vector.broadcast %25 : vector<2x8x1xf32> to vector<2x8x8xf32>
    %27 = arith.mulf %22, %26 : vector<2x8x8xf32>
    %28 = arith.truncf %27 : vector<2x8x8xf32> to vector<2x8x8xbf16>
    %cst_13 = arith.constant dense<0.000000e+00> : vector<2x8x128xf32>
    %29 = tpu.matmul %28, %14, %cst_13 {dimension_numbers = #tpu.dot_dimension_numbers<[2], [1], [1], [2], [0, 0, 0, 1, 1, 2], [0], [0]>} : vector<2x8x8xbf16>, vector<2x8x128xbf16>, vector<2x8x128xf32> -> vector<2x8x128xf32>
    %30 = vector.shape_cast %29 : vector<2x8x128xf32> to vector<16x128xf32>
    %31 = arith.truncf %30 : vector<16x128xf32> to vector<16x128xbf16>
    %cst_14 = arith.constant dense<0.000000e+00> : vector<16x128xf32>
    %32 = tpu.matmul %31, %10, %cst_14 {dimension_numbers = #tpu.dot_dimension_numbers<[1], [0], [0], [1], [0, 0, 1, 1], [], []>} : vector<16x128xbf16>, vector<128x128xbf16>, vector<16x128xf32> -> vector<16x128xf32>
    %33 = vector.broadcast %11 : vector<1x128xf32> to vector<16x128xf32>
    %34 = arith.addf %32, %33 : vector<16x128xf32>
    %c0_15 = arith.constant 0 : index
    %c0_16 = arith.constant 0 : index
    %35 = vector.load %arg6[%c0_15, %c0_16] : memref<16x128xf32, #tpu.memory_space<vmem>>, vector<16x128xf32>
    tpu.vector_store %arg6[%c0_15, %c0_16], %34 {strides = array<i32>} : memref<16x128xf32, #tpu.memory_space<vmem>>, vector<16x128xf32>,
    return
  }
  func.func @transform_0(%arg0: i32) -> (i32, i32) {
    %c0_i32 = arith.constant 0 : i32
    %c0_i32_0 = arith.constant 0 : i32
    return %arg0, %c0_i32 : i32, i32
  }
  func.func @transform_1(%arg0: i32) -> (i32, i32) {
    %c0_i32 = arith.constant 0 : i32
    %c0_i32_0 = arith.constant 0 : i32
    %c0_i32_1 = arith.constant 0 : i32
    return %c0_i32, %c0_i32_0 : i32, i32
  }
  func.func @transform_2(%arg0: i32) -> (i32, i32) {
    %c0_i32 = arith.constant 0 : i32
    %c0_i32_0 = arith.constant 0 : i32
    %c0_i32_1 = arith.constant 0 : i32
    return %c0_i32, %c0_i32_0 : i32, i32
  }
  func.func @transform_3(%arg0: i32) -> (i32, i32) {
    %c0_i32 = arith.constant 0 : i32
    %c0_i32_0 = arith.constant 0 : i32
    %c0_i32_1 = arith.constant 0 : i32
    return %c0_i32, %c0_i32_0 : i32, i32
  }
  func.func @transform_4(%arg0: i32) -> (i32, i32) {
    %c0_i32 = arith.constant 0 : i32
    %c0_i32_0 = arith.constant 0 : i32
    %c0_i32_1 = arith.constant 0 : i32
    return %c0_i32, %c0_i32_0 : i32, i32
  }
  func.func @transform_5(%arg0: i32) -> (i32, i32) {
    %c0_i32 = arith.constant 0 : i32
    %c0_i32_0 = arith.constant 0 : i32
    return %arg0, %c0_i32 : i32, i32
  }
}

module attributes {stable_mosaic.version = 11 : i64} {
  func.func @_self_attn_kernel(%arg0: i32, %arg1: memref<16x128xbf16, #tpu.memory_space<vmem>>, %arg2: memref<128x384xbf16, #tpu.memory_space<vmem>>, %arg3: memref<1x384xf32, #tpu.memory_space<vmem>>, %arg4: memref<128x128xbf16, #tpu.memory_space<vmem>>, %arg5: memref<1x128xf32, #tpu.memory_space<vmem>>, %arg6: memref<16x128xf32, #tpu.memory_space<vmem>>) attributes {dimension_semantics = [#tpu.dimension_semantics<parallel>], iteration_bounds = array<i64: 1>, scalar_prefetch = 0 : i64, scratch_operands = 0 : i64, tpu.core_type = #tpu.core_type<tc>, window_params = [{transform_indices = @transform_0, window_bounds = array<i64: 16, 128>}, {pipeline_mode = #tpu.pipeline_mode<synchronous>, transform_indices = @transform_1, window_bounds = array<i64: 128, 384>}, {pipeline_mode = #tpu.pipeline_mode<synchronous>, transform_indices = @transform_2, window_bounds = array<i64: 1, 384>}, {pipeline_mode = #tpu.pipeline_mode<synchronous>, transform_indices = @transform_3, window_bounds = array<i64: 128, 128>}, {pipeline_mode = #tpu.pipeline_mode<synchronous>, transform_indices = @transform_4, window_bounds = array<i64: 1, 128>}, {transform_indices = @transform_5, window_bounds = array<i64: 16, 128>}]} {
    %c0 = arith.constant 0 : index
    %c0_0 = arith.constant 0 : index
    %0 = vector.load %arg1[%c0, %c0_0] : memref<16x128xbf16, #tpu.memory_space<vmem>>, vector<16x128xbf16>
    %c0_1 = arith.constant 0 : index
    %c0_2 = arith.constant 0 : index
    %1 = vector.load %arg2[%c0_1, %c0_2] : memref<128x384xbf16, #tpu.memory_space<vmem>>, vector<128x384xbf16>
    %cst = arith.constant dense<0.000000e+00> : vector<16x384xf32>
    %2 = tpu.matmul %0, %1, %cst {dimension_numbers = #tpu.dot_dimension_numbers<[1], [0], [0], [1], [0, 0, 1, 1], [], []>} : vector<16x128xbf16>, vector<128x384xbf16>, vector<16x384xf32> -> vector<16x384xf32>
    %c0_3 = arith.constant 0 : index
    %c0_4 = arith.constant 0 : index
    %3 = vector.load %arg3[%c0_3, %c0_4] : memref<1x384xf32, #tpu.memory_space<vmem>>, vector<1x384xf32>
    %4 = vector.broadcast %3 : vector<1x384xf32> to vector<16x384xf32>
    %5 = arith.addf %2, %4 : vector<16x384xf32>
    %6 = arith.truncf %5 : vector<16x384xf32> to vector<16x384xbf16>
    %7 = vector.extract_strided_slice %6 {offsets = [0, 0], sizes = [16, 128], strides = [1, 1]} : vector<16x384xbf16> to vector<16x128xbf16>
    %8 = vector.extract_strided_slice %6 {offsets = [0, 128], sizes = [16, 128], strides = [1, 1]} : vector<16x384xbf16> to vector<16x128xbf16>
    %9 = vector.extract_strided_slice %6 {offsets = [0, 256], sizes = [16, 128], strides = [1, 1]} : vector<16x384xbf16> to vector<16x128xbf16>
    %c0_5 = arith.constant 0 : index
    %c0_6 = arith.constant 0 : index
    %10 = vector.load %arg4[%c0_5, %c0_6] : memref<128x128xbf16, #tpu.memory_space<vmem>>, vector<128x128xbf16>
    %c0_7 = arith.constant 0 : index
    %c0_8 = arith.constant 0 : index
    %11 = vector.load %arg5[%c0_7, %c0_8] : memref<1x128xf32, #tpu.memory_space<vmem>>, vector<1x128xf32>
    %12 = vector.shape_cast %7 : vector<16x128xbf16> to vector<2x8x128xbf16>
    %13 = vector.shape_cast %8 : vector<16x128xbf16> to vector<2x8x128xbf16>
    %14 = vector.shape_cast %9 : vector<16x128xbf16> to vector<2x8x128xbf16>
    %cst_9 = arith.constant dense<0.000000e+00> : vector<2x8x8xf32>
    %15 = tpu.matmul %12, %13, %cst_9 {dimension_numbers = #tpu.dot_dimension_numbers<[2], [2], [1], [1], [0, 0, 0, 1, 1, 1], [0], [0]>} : vector<2x8x128xbf16>, vector<2x8x128xbf16>, vector<2x8x8xf32> -> vector<2x8x8xf32>
    %cst_10 = arith.constant 0.0883883461 : f32
    %16 = vector.broadcast %cst_10 : f32 to vector<2x8x8xf32>
    %17 = arith.mulf %15, %16 : vector<2x8x8xf32>
    %cst_11 = arith.constant dense<0xFF800000> : vector<2x8xf32>
    %18 = vector.multi_reduction <maximumf>, %17, %cst_11 [2] : vector<2x8x8xf32> to vector<2x8xf32>
    %19 = vector.shape_cast %18 : vector<2x8xf32> to vector<2x8x1xf32>
    %20 = vector.broadcast %19 : vector<2x8x1xf32> to vector<2x8x8xf32>
    %21 = arith.subf %17, %20 : vector<2x8x8xf32>
    %22 = math.exp %21 : vector<2x8x8xf32>
    %cst_12 = arith.constant dense<0.000000e+00> : vector<2x8xf32>
    %23 = vector.multi_reduction <add>, %22, %cst_12 [2] : vector<2x8x8xf32> to vector<2x8xf32>
    %24 = vector.shape_cast %23 : vector<2x8xf32> to vector<2x8x1xf32>
    %25 = tpu.reciprocal %24 {approx = true} : vector<2x8x1xf32> -> vector<2x8x1xf32>
    %26 = vector.broadcast %25 : vector<2x8x1xf32> to vector<2x8x8xf32>
    %27 = arith.mulf %22, %26 : vector<2x8x8xf32>
    %28 = arith.truncf %27 : vector<2x8x8xf32> to vector<2x8x8xbf16>
    %cst_13 = arith.constant dense<0.000000e+00> : vector<2x8x128xf32>
    %29 = tpu.matmul %28, %14, %cst_13 {dimension_numbers = #tpu.dot_dimension_numbers<[2], [1], [1], [2], [0, 0, 0, 1, 1, 2], [0], [0]>} : vector<2x8x8xbf16>, vector<2x8x128xbf16>, vector<2x8x128xf32> -> vector<2x8x128xf32>
    %30 = vector.shape_cast %29 : vector<2x8x128xf32> to vector<16x128xf32>
    %31 = arith.truncf %30 : vector<16x128xf32> to vector<16x128xbf16>
    %cst_14 = arith.constant dense<0.000000e+00> : vector<16x128xf32>
    %32 = tpu.matmul %31, %10, %cst_14 {dimension_numbers = #tpu.dot_dimension_numbers<[1], [0], [0], [1], [0, 0, 1, 1], [], []>} : vector<16x128xbf16>, vector<128x128xbf16>, vector<16x128xf32> -> vector<16x128xf32>
    %33 = vector.broadcast %11 : vector<1x128xf32> to vector<16x128xf32>
    %34 = arith.addf %32, %33 : vector<16x128xf32>
    %c0_15 = arith.constant 0 : index
    %c0_16 = arith.constant 0 : index
    %35 = vector.load %arg6[%c0_15, %c0_16] : memref<16x128xf32, #tpu.memory_space<vmem>>, vector<16x128xf32>
    tpu.vector_store %arg6[%c0_15, %c0_16], %34 {strides = array<i32>} : memref<16x128xf32, #tpu.memory_space<vmem>>, vector<16x128xf32>,
    return
  }
  func.func @transform_0(%arg0: i32) -> (i32, i32) {
    %c0_i32 = arith.constant 0 : i32
    %c0_i32_0 = arith.constant 0 : i32
    return %arg0, %c0_i32 : i32, i32
  }
  func.func @transform_1(%arg0: i32) -> (i32, i32) {
    %c0_i32 = arith.constant 0 : i32
    %c0_i32_0 = arith.constant 0 : i32
    %c0_i32_1 = arith.constant 0 : i32
    return %c0_i32, %c0_i32_0 : i32, i32
  }
  func.func @transform_2(%arg0: i32) -> (i32, i32) {
    %c0_i32 = arith.constant 0 : i32
    %c0_i32_0 = arith.constant 0 : i32
    %c0_i32_1 = arith.constant 0 : i32
    return %c0_i32, %c0_i32_0 : i32, i32
  }
  func.func @transform_3(%arg0: i32) -> (i32, i32) {
    %c0_i32 = arith.constant 0 : i32
    %c0_i32_0 = arith.constant 0 : i32
    %c0_i32_1 = arith.constant 0 : i32
    return %c0_i32, %c0_i32_0 : i32, i32
  }
  func.func @transform_4(%arg0: i32) -> (i32, i32) {
    %c0_i32 = arith.constant 0 : i32
    %c0_i32_0 = arith.constant 0 : i32
    %c0_i32_1 = arith.constant 0 : i32
    return %c0_i32, %c0_i32_0 : i32, i32
  }
  func.func @transform_5(%arg0: i32) -> (i32, i32) {
    %c0_i32 = arith.constant 0 : i32
    %c0_i32_0 = arith.constant 0 : i32
    return %arg0, %c0_i32 : i32, i32
  }
}

</mosaic_0001>

<bundles_post_ra>
// kernel: tpu_custom_call.1
= control target key start
LH: loop header
LB: loop body
LE: loop exit
PB: predicated region body
PF: predicated region fallthrough
CT: control target
= control target key end

     0   :  { %10 = vsyncpa [#allocation3], 0  ;;  %s899_s0 = inlined_call_operand.hbm [shape: bf16[16,128], index: 0, kind: input, shape index: {}]   ;;  %s900_s1 = inlined_call_operand.hbm [shape: bf16[128,384], index: 1, kind: input, shape index: {}]   ;;  %s901_s2 = inlined_call_operand.hbm [shape: f32[1,384], index: 2, kind: input, shape index: {}]   ;;  %s902_s3 = inlined_call_operand.hbm [shape: bf16[128,128], index: 3, kind: input, shape index: {}]   ;;  %s903_s4 = inlined_call_operand.vmem [shape: f32[1,128], index: 4, kind: input, shape index: {}]   ;;  %s904_s5 = inlined_call_operand.hbm [shape: f32[16,128], index: 5, kind: output, shape index: {}]  }
   0x1   :  { %11 = vsyncpa [#allocation6], 0 }
   0x2   :  { %12 = vsyncpa [#allocation9], 0  ;;  %s31_s20 = sshll.u32 %s900_s1, 4  ;;  %s32_s20 = int_to_ptr.hbm [resolvable:$true] %s31_s20 }
   0x3   :  { %13 = vsyncpa [#allocation4], 0  ;;  %s824_s21 = smov [#allocation5]   ;;  %s18_s25 = sshll.u32 %s899_s0, 4  ;;  %s19_s25 = int_to_ptr.hbm [resolvable:$true] %s18_s25 }
   0x4   :  { %s33_s22 = sshll.u32 %s824_s21, 4  ;;  %s825_s26 = smov 192   ;;  %s34_s22 = int_to_ptr.vmem [resolvable:$true] %s33_s22 }
   0x5   :  { %s826_s27 = smov 12   ;;  %s827_s28 = smov [#allocation2]  }
   0x6   :  { %39 = dma.hbm_to_vmem [thread:$0]  %s32_s20, 3072, %s34_s22, [#allocation6], %s825_s26, %s825_s26, %s826_s27  }
   0x7   :  { %s20_s29 = sshll.u32 %s827_s28, 4  ;;  %s828_s30 = smov 64   ;;  %s21_s29 = int_to_ptr.vmem [resolvable:$true] %s20_s29 }
   0x8   :  { %s829_s6 = smov 4   ;;  %s45_s8 = sshll.u32 %s901_s2, 4  ;;  %s46_s8 = int_to_ptr.hbm [resolvable:$true] %s45_s8 }
   0x9   :  { %26 = dma.hbm_to_vmem [thread:$0]  %s19_s25, 128, %s21_s29, [#allocation3], %s828_s30, %s828_s30, %s829_s6  }
   0xa   :  { %s830_s9 = smov [#allocation7]   ;;  %s55_s12 = sshll.u32 %s902_s3, 4  ;;  %s56_s12 = int_to_ptr.hbm [resolvable:$true] %s55_s12 }
   0xb   :  { %s47_s10 = sshll.u32 %s830_s9, 4  ;;  %s831_s13 = smov [#allocation8]   ;;  %s48_s10 = int_to_ptr.vmem [resolvable:$true] %s47_s10 }
   0xc   :  { %50 = dma.hbm_to_vmem [thread:$0]  %s46_s8, 48, %s48_s10, [#allocation6]  }
   0xd   :  { %s57_s14 = sshll.u32 %s831_s13, 4  ;;  %s58_s14 = int_to_ptr.vmem [resolvable:$true] %s57_s14 }
   0xe   :  { %63 = dma.hbm_to_vmem [thread:$0]  %s56_s12, 1024, %s58_s14, [#allocation9], %s828_s30, %s828_s30, %s829_s6  }
   0xf   :  { %816 = dma.done.wait [#allocation3], 128  }
  0x10   :  { %817 = vsyncadd [#allocation3], 4294967168 }
  0x11   :  { %818 = dma.done.wait [#allocation6], 3120  }
  0x12   :  { %819 = vsyncadd [#allocation6], 4294964176 }
  0x13   :  { %820 = dma.done.wait [#allocation9], 1024  }
  0x14   :  { %821 = vsyncadd [#allocation9], 4294966272  ;;  %v599_v0 = vld [vmem:[#allocation5 + $0xa8] sm:$0xf]  ;;  %v666_v1 = vld [vmem:[#allocation5 + $0xb0] sm:$0xf0] }
  0x15   :  { %v665_v2 = vld [vmem:[#allocation5 + $0xac] sm:$0xf]  ;;  %v600_v3 = vor.u32 %v666_v1, %v599_v0  ;;  %v601_v4 = vld [vmem:[#allocation5 + $0xb4] sm:$0xf0]  ;;  %v587_v5 = vld [vmem:[#allocation5 + $0x90] sm:$0xf] }
  0x16   :  { %v663_v6 = vld [vmem:[#allocation5 + $0x98] sm:$0xf0]  ;;  %v604_v7 = vor.u32 %v665_v2, %v601_v4  ;;  %v662_v8 = vld [vmem:[#allocation5 + $0x94] sm:$0xf]  ;;  %v589_v9 = vld [vmem:[#allocation5 + $0x9c] sm:$0xf0] }
  0x17   :  { %259 = vmatpush.bf16.msra.mxu0 %v600_v3  ;;  %v588_v10 = vor.u32 %v663_v6, %v587_v5  ;;  %v592_v11 = vor.u32 %v662_v8, %v589_v9  ;;  %v575_v12 = vld [vmem:[#allocation5 + $0x78] sm:$0xf]  ;;  %v660_v13 = vld [vmem:[#allocation5 + $0x80] sm:$0xf0]  ;;  %v659_v14 = vld [vmem:[#allocation5 + $0x7c] sm:$0xf] }
  0x18   :  { %273 = vmatpush.bf16.msra.mxu1 %v604_v7  ;;  %v577_v15 = vld [vmem:[#allocation5 + $0x84] sm:$0xf0]  ;;  %v576_v16 = vor.u32 %v660_v13, %v575_v12  ;;  %v563_v18 = vld [vmem:[#allocation5 + $0x60] sm:$0xf]  ;;  %v657_v19 = vld [vmem:[#allocation5 + $0x68] sm:$0xf0] }
  0x19   :  { %v580_v17 = vor.u32 %v659_v14, %v577_v15  ;;  %v656_v20 = vld [vmem:[#allocation5 + $0x64] sm:$0xf]  ;;  %v565_v21 = vld [vmem:[#allocation5 + $0x6c] sm:$0xf0]  ;;  %v564_v22 = vor.u32 %v657_v19, %v563_v18  ;;  %v551_v24 = vld [vmem:[#allocation5 + $0x48] sm:$0xf] }
  0x1a   :  { %v568_v23 = vor.u32 %v656_v20, %v565_v21  ;;  %v654_v25 = vld [vmem:[#allocation5 + $0x50] sm:$0xf0]  ;;  %v653_v26 = vld [vmem:[#allocation5 + $0x4c] sm:$0xf]  ;;  %v553_v27 = vld [vmem:[#allocation5 + $0x54] sm:$0xf0] }
  0x1b   :  { %260 = vmatpush.bf16.msra.mxu0 %v588_v10  ;;  %v552_v28 = vor.u32 %v654_v25, %v551_v24  ;;  %v556_v29 = vor.u32 %v653_v26, %v553_v27  ;;  %v539_v30 = vld [vmem:[#allocation5 + $0x30] sm:$0xf]  ;;  %v651_v31 = vld [vmem:[#allocation5 + $0x38] sm:$0xf0]  ;;  %v650_v32 = vld [vmem:[#allocation5 + $0x34] sm:$0xf] }
  0x1c   :  { %274 = vmatpush.bf16.msra.mxu1 %v592_v11  ;;  %v541_v33 = vld [vmem:[#allocation5 + $0x3c] sm:$0xf0]  ;;  %v540_v34 = vor.u32 %v651_v31, %v539_v30  ;;  %v527_v36 = vld [vmem:[#allocation5 + $0x18] sm:$0xf]  ;;  %v648_v37 = vld [vmem:[#allocation5 + $0x20] sm:$0xf0] }
  0x1d   :  { %v544_v35 = vor.u32 %v650_v32, %v541_v33  ;;  %v647_v38 = vld [vmem:[#allocation5 + $0x1c] sm:$0xf]  ;;  %v529_v39 = vld [vmem:[#allocation5 + $0x24] sm:$0xf0]  ;;  %v528_v40 = vor.u32 %v648_v37, %v527_v36  ;;  %v515_v42 = vld [vmem:[#allocation5] sm:$0xf] }
  0x1e   :  { %v532_v41 = vor.u32 %v647_v38, %v529_v39  ;;  %v645_v43 = vld [vmem:[#allocation5 + $0x8] sm:$0xf0]  ;;  %v644_v44 = vld [vmem:[#allocation5 + $0x4] sm:$0xf]  ;;  %v517_v45 = vld [vmem:[#allocation5 + $0xc] sm:$0xf0] }
  0x1f   :  { %261 = vmatpush.bf16.msra.mxu0 %v576_v16  ;;  %v516_v46 = vor.u32 %v645_v43, %v515_v42  ;;  %v520_v47 = vor.u32 %v644_v44, %v517_v45  ;;  %v877_v48 = vld [vmem:[#allocation2] sm:$0xff]  ;;  %v881_v49 = vld [vmem:[#allocation7] sm:$0x7]  ;;  %v607_v0 = vld [vmem:[#allocation5 + $0xb0] sm:$0xf]  ;;  %vm356_vm0 = vcmask 64512  }
  0x20   :  { %275 = vmatpush.bf16.msra.mxu1 %v580_v17  ;;  %v119_v50 = vperm.slane %v881_v49, 0  ;;  %v120_v51 = vperm.slane %v881_v49, 1  ;;  %v667_v1 = vld [vmem:[#allocation5 + $0xb8] sm:$0xf0]  ;;  %v595_v2 = vld [vmem:[#allocation5 + $0x98] sm:$0xf] }
  0x21   :  { %v608_v3 = vor.u32 %v667_v1, %v607_v0  ;;  %v664_v4 = vld [vmem:[#allocation5 + $0xa0] sm:$0xf0]  ;;  %v583_v6 = vld [vmem:[#allocation5 + $0x80] sm:$0xf]  ;;  %v661_v7 = vld [vmem:[#allocation5 + $0x88] sm:$0xf0] }
  0x22   :  { %v596_v5 = vor.u32 %v664_v4, %v595_v2  ;;  %v584_v8 = vor.u32 %v661_v7, %v583_v6  ;;  %v571_v10 = vld [vmem:[#allocation5 + $0x68] sm:$0xf]  ;;  %v658_v11 = vld [vmem:[#allocation5 + $0x70] sm:$0xf0]  ;;  %v559_v15 = vld [vmem:[#allocation5 + $0x50] sm:$0xf] }
  0x23   :  { %262 = vmatpush.bf16.msra.mxu0 %v564_v22  ;;  %287 = vmatpush.bf16.msra.mxu2 %v608_v3  ;;  %v572_v14 = vor.u32 %v658_v11, %v571_v10  ;;  %v655_v16 = vld [vmem:[#allocation5 + $0x58] sm:$0xf0]  ;;  %v547_v19 = vld [vmem:[#allocation5 + $0x38] sm:$0xf]  ;;  %v652_v20 = vld [vmem:[#allocation5 + $0x40] sm:$0xf0] }
  0x24   :  { %276 = vmatpush.bf16.msra.mxu1 %v568_v23  ;;  %v560_v17 = vor.u32 %v655_v16, %v559_v15  ;;  %v548_v21 = vor.u32 %v652_v20, %v547_v19  ;;  %v535_v22 = vld [vmem:[#allocation5 + $0x20] sm:$0xf]  ;;  %v649_v23 = vld [vmem:[#allocation5 + $0x28] sm:$0xf0]  ;;  %v523_v26 = vld [vmem:[#allocation5 + $0x8] sm:$0xf] }
  0x25   :  { %v536_v24 = vor.u32 %v649_v23, %v535_v22  ;;  %v646_v27 = vld [vmem:[#allocation5 + $0x10] sm:$0xf0]  ;;  %v121_v42 = vperm.slane %v881_v49, 2  ;;  %vm384_vm1 = vcmask 1043456   ;;  %v672_v49 = vld [vmem:[#allocation8 + $0x20] sm:$0xff]  ;;  %v669_v1 = vld [vmem:[#allocation8 + $0x8] sm:$0xff] }
  0x26   :  { %v524_v30 = vor.u32 %v646_v27, %v523_v26  ;;  %v670_v0 = vld [vmem:[#allocation8 + $0x10] sm:$0xff]  ;;  %v668_v2 = vld [vmem:[#allocation8] sm:$0xff]  ;;  %s832_s15 = smov [#allocation10]   ;;  %s494_s19 = sshll.u32 %s904_s5, 4  ;;  %s495_s19 = int_to_ptr.hbm [resolvable:$true] %s494_s19 }
  0x27   :  { %263 = vmatpush.bf16.msra.mxu0 %v552_v28  ;;  %288 = vmatpush.bf16.msra.mxu2 %v596_v5  ;;  %s492_s16 = sshll.u32 %s832_s15, 4  ;;  %s833_s20 = smov 128   ;;  %s493_s16 = int_to_ptr.vmem [resolvable:$true] %s492_s16 }
  0x28   :  { %277 = vmatpush.bf16.msra.mxu1 %v556_v29  ;;  %s834_s21 = smov 8  }
  0x2b   :  { %264 = vmatpush.bf16.msra.mxu0 %v540_v34  ;;  %289 = vmatpush.bf16.msra.mxu2 %v584_v8  ;;  %v687_v8 = vld [vmem:[%s903_s4] ss:$0 sm:$0xff] }
  0x2c   :  { %278 = vmatpush.bf16.msra.mxu1 %v544_v35 }
  0x2f   :  { %265 = vmatpush.bf16.msra.mxu0 %v528_v40  ;;  %290 = vmatpush.bf16.msra.mxu2 %v572_v14 }
  0x30   :  { %279 = vmatpush.bf16.msra.mxu1 %v532_v41 }
  0x33   :  { %266 = vmatpush.bf16.msra.mxu0 %v516_v46  ;;  %291 = vmatpush.bf16.msra.mxu2 %v560_v17 }
  0x34   :  { %280 = vmatpush.bf16.msra.mxu1 %v520_v47 }
  0x36   :  { %267 = vmatmul.bf16.vlgmr.msra.gmra.mxu0 %v877_v48 }
  0x37   :  { %281 = vmatmul.bf16.vlgmr.msra.gmra.mxu1 %v877_v48  ;;  %292 = vmatpush.bf16.msra.mxu2 %v548_v21 }
  0x3b   :  { %293 = vmatpush.bf16.msra.mxu2 %v536_v24 }
  0x3f   :  { %294 = vmatpush.bf16.msra.mxu2 %v524_v30 }
  0x42   :  { %295 = vmatmul.bf16.vlgmr.msra.gmra.mxu2 %v877_v48 }
  0xb3   :  { %v268_v52 = vpop.f32.mrf.mxu0 }
  0xb4   :  { %v269_v53 = vadd.f32 %v268_v52, %v119_v50  ;;  %v282_v54 = vpop.f32.mrf.mxu1  ;;  %v675_v52 = vld [vmem:[#allocation8 + $0x38] sm:$0xff] }
  0xb5   :  { %v283_v55 = vadd.f32 %v282_v54, %v120_v51  ;;  %472 = vmatpush.bf16.msrb.mxu1 %v675_v52 }
  0xb7   :  { %v301_v56 = vpack.c.bf16 %v283_v55, %v269_v53  ;;  %v674_v53 = vld [vmem:[#allocation8 + $0x30] sm:$0xff]  ;;  %v673_v55 = vld [vmem:[#allocation8 + $0x28] sm:$0xff] }
  0xb9   :  { %v324_v57 = vrot.slane %v301_v56, 4  ;;  %473 = vmatpush.bf16.msrb.mxu1 %v674_v53 }
  0xbb   :  { %335 = vmatpush.bf16.xpose.msra.mxu3 %v324_v57  ;;  %v270_v58 = vpop.f32.mrf.mxu0 }
  0xbc   :  { %v271_v59 = vadd.f32 %v270_v58, %v119_v50  ;;  %v284_v60 = vpop.f32.mrf.mxu1 }
  0xbd   :  { %v285_v61 = vadd.f32 %v284_v60, %v120_v51  ;;  %474 = vmatpush.bf16.msrb.mxu1 %v673_v55 }
  0xbf   :  { %v303_v62 = vpack.c.bf16 %v285_v61, %v271_v59  ;;  %v671_v59 = vld [vmem:[#allocation8 + $0x18] sm:$0xff] }
  0xc1   :  { %v325_v63 = vrot.slane %v303_v62, 4  ;;  %475 = vmatpush.bf16.msrb.mxu1 %v672_v49 }
  0xc2   :  { %336 = vmatmul.bf16.vlgmr.msra.gmra.mxu3 %v301_v56 }
  0xc3   :  { %348 = vmatpush.bf16.xpose.msrb.mxu3 %v325_v63 }
  0xc5   :  { %v296_v43 = vpop.f32.mrf.mxu2  ;;  %476 = vmatpush.bf16.msrb.mxu1 %v671_v59 }
  0xc6   :  { %v297_v44 = vadd.f32 %v296_v43, %v121_v42 }
  0xc8   :  { %v302_v45 = vpack.c.bf16 %v297_v44, %v297_v44 }
  0xc9   :  { %477 = vmatpush.bf16.msrb.mxu1 %v670_v0 }
  0xca   :  { %v386_v46 = vsel %vm384_vm1, %v302_v45, 0 }
  0xcb   :  { %395 = vmatpush.bf16.msra.mxu3 %v386_v46 }
  0xcd   :  { %v298_v47 = vpop.f32.mrf.mxu2  ;;  %478 = vmatpush.bf16.msrb.mxu1 %v669_v1 }
  0xce   :  { %v299_v48 = vadd.f32 %v298_v47, %v121_v42 }
  0xd0   :  { %v304_v50 = vpack.c.bf16 %v299_v48, %v299_v48 }
  0xd1   :  { %479 = vmatpush.bf16.msrb.mxu1 %v668_v2 }
  0xd2   :  { %349 = vmatmul.bf16.vlgmr.msrb.gmra.mxu3 %v303_v62  ;;  %v405_v51 = vsel %vm384_vm1, %v304_v50, 0 }
  0xd3   :  { %414 = vmatpush.bf16.msrb.mxu0 %v405_v51 }
 0x145   :  { %v337_v9 = vpop.f32.mrf.mxu3 }
 0x146   :  { %v354_v12 = vmul.f32 0.088388346, %v337_v9 }
 0x148   :  { %v357_v13 = vsel %vm356_vm0, %v354_v12, -inf }
 0x149   :  { %358 = vmax.xlane.f32.xlu0 %v357_v13 }
 0x14d   :  { %v339_v18 = vpop.f32.mrf.mxu3 }
 0x155   :  { %v350_v25 = vpop.f32.mrf.mxu3 }
 0x156   :  { %v355_v28 = vmul.f32 0.088388346, %v350_v25 }
 0x158   :  { %v360_v29 = vsel %vm356_vm0, %v355_v28, -inf }
 0x159   :  { %361 = vmax.xlane.f32.xlu0 %v360_v29 }
 0x15d   :  { %v352_v31 = vpop.f32.mrf.mxu3 }
 0x1bc   :  { %v359_v32 = vpop.xlane.xlu0 %358 }
 0x1bd   :  { %v363_v33 = vsub.f32 %v354_v12, %v359_v32 }
 0x1bf   :  { %v365_v34 = vmul.f32 1.442695, %v363_v33 }
 0x1c1   :  { %688 = vpow2.f32 %v365_v34 }
 0x1c7   :  { %v689_v35 = vpop.eup %688 }
 0x1c8   :  { %v369_v36 = vsel %vm356_vm0, %v689_v35, 0.0 }
 0x1c9   :  { %370 = vadd.xlane.f32.xlu1 %v369_v36 }
 0x1cc   :  { %v362_v37 = vpop.xlane.xlu0 %361 }
 0x1cd   :  { %v364_v38 = vsub.f32 %v355_v28, %v362_v37 }
 0x1cf   :  { %v367_v39 = vmul.f32 1.442695, %v364_v38 }
 0x1d1   :  { %690 = vpow2.f32 %v367_v39 }
 0x1d7   :  { %v691_v40 = vpop.eup %690 }
 0x1d8   :  { %v372_v41 = vsel %vm356_vm0, %v691_v40, 0.0 }
 0x1d9   :  { %373 = vadd.xlane.f32.xlu1 %v372_v41 }
 0x23c   :  { %v371_v54 = vpop.xlane.xlu1 %370 }
 0x23d   :  { %692 = vrcp.f32 %v371_v54 }
 0x243   :  { %v693_v56 = vpop.eup %692 }
 0x244   :  { %v377_v57 = vmul.f32 %v693_v56, %v689_v35 }
 0x246   :  { %v379_v58 = vpack.c.bf16 %v377_v57, %v377_v57 }
 0x248   :  { %609 = vmatmul.msk.bf16.vlgmr.msra.gmra.mxu3 %vm356_vm0, %v379_v58 }
 0x24c   :  { %v374_v60 = vpop.xlane.xlu1 %373 }
 0x24d   :  { %694 = vrcp.f32 %v374_v60 }
 0x253   :  { %v695_v61 = vpop.eup %694 }
 0x254   :  { %v378_v62 = vmul.f32 %v695_v61, %v691_v40 }
 0x256   :  { %v380_v63 = vpack.c.bf16 %v378_v62, %v378_v62 }
 0x258   :  { %610 = vmatmul.msk.bf16.vlgmr.msrb.gmra.mxu0 %vm356_vm0, %v380_v63 }
 0x2cb   :  { %v397_v3 = vpop.f32.mrf.mxu3 }
 0x2d3   :  { %v399_v4 = vpop.f32.mrf.mxu3 }
 0x2d5   :  { %v416_v5 = vpop.f32.mrf.mxu0 }
 0x2d6   :  { %v420_v6 = vpack.c.bf16 %v416_v5, %v397_v3 }
 0x2d8   :  { %480 = vmatmul.bf16.vlgmr.msrb.gmra.mxu1 %v420_v6 }
 0x2dd   :  { %v418_v7 = vpop.f32.mrf.mxu0 }
 0x355   :  { %v481_v9 = vpop.f32.mrf.mxu1 }
 0x356   :  { %v482_v10 = vadd.f32 %v687_v8, %v481_v9 }
 0x358   :  { %486 = vst [vmem:[#allocation10] sm:$0xff] %v482_v10 }
 0x35d   :  { %v483_v11 = vpop.f32.mrf.mxu1 }
 0x35e   :  { %v484_v12 = vadd.f32 %v687_v8, %v483_v11 }
 0x360   :  { %487 = vst [vmem:[#allocation10 + $0x8] sm:$0xff] %v484_v12 }
 0x361   :  { %500 = dma.vmem_to_hbm [thread:$0]  %s493_s16, 256, %s495_s19, [#allocation4], %s833_s20, %s833_s20, %s834_s21  }
 0x362   :  { %822 = dma.done.wait [#allocation4], 256  }
 0x363   :  { %823 = vsyncadd [#allocation4], 4294967040 }
 0x364   :  { %505 = vsyncpa [#allocation3], 1 }
 0x365   :  { %506 = vsyncpa [#allocation6], 1 }
 0x366   :  { %507 = vsyncpa [#allocation9], 1 }
 0x367   :  { %508 = vsyncpa [#allocation4], 1 }

// kernel: tpu_custom_call.1
= control target key start
LH: loop header
LB: loop body
LE: loop exit
PB: predicated region body
PF: predicated region fallthrough
CT: control target
= control target key end

     0   :  { %10 = vsyncpa [#allocation3], 0  ;;  %s899_s0 = inlined_call_operand.hbm [shape: bf16[16,128], index: 0, kind: input, shape index: {}]   ;;  %s900_s1 = inlined_call_operand.hbm [shape: bf16[128,384], index: 1, kind: input, shape index: {}]   ;;  %s901_s2 = inlined_call_operand.hbm [shape: f32[1,384], index: 2, kind: input, shape index: {}]   ;;  %s902_s3 = inlined_call_operand.hbm [shape: bf16[128,128], index: 3, kind: input, shape index: {}]   ;;  %s903_s4 = inlined_call_operand.vmem [shape: f32[1,128], index: 4, kind: input, shape index: {}]   ;;  %s904_s5 = inlined_call_operand.hbm [shape: f32[16,128], index: 5, kind: output, shape index: {}]  }
   0x1   :  { %11 = vsyncpa [#allocation6], 0 }
   0x2   :  { %12 = vsyncpa [#allocation9], 0  ;;  %s31_s20 = sshll.u32 %s900_s1, 4  ;;  %s32_s20 = int_to_ptr.hbm [resolvable:$true] %s31_s20 }
   0x3   :  { %13 = vsyncpa [#allocation4], 0  ;;  %s824_s21 = smov [#allocation5]   ;;  %s18_s25 = sshll.u32 %s899_s0, 4  ;;  %s19_s25 = int_to_ptr.hbm [resolvable:$true] %s18_s25 }
   0x4   :  { %s33_s22 = sshll.u32 %s824_s21, 4  ;;  %s825_s26 = smov 192   ;;  %s34_s22 = int_to_ptr.vmem [resolvable:$true] %s33_s22 }
   0x5   :  { %s826_s27 = smov 12   ;;  %s827_s28 = smov [#allocation2]  }
   0x6   :  { %39 = dma.hbm_to_vmem [thread:$0]  %s32_s20, 3072, %s34_s22, [#allocation6], %s825_s26, %s825_s26, %s826_s27  }
   0x7   :  { %s20_s29 = sshll.u32 %s827_s28, 4  ;;  %s828_s30 = smov 64   ;;  %s21_s29 = int_to_ptr.vmem [resolvable:$true] %s20_s29 }
   0x8   :  { %s829_s6 = smov 4   ;;  %s45_s8 = sshll.u32 %s901_s2, 4  ;;  %s46_s8 = int_to_ptr.hbm [resolvable:$true] %s45_s8 }
   0x9   :  { %26 = dma.hbm_to_vmem [thread:$0]  %s19_s25, 128, %s21_s29, [#allocation3], %s828_s30, %s828_s30, %s829_s6  }
   0xa   :  { %s830_s9 = smov [#allocation7]   ;;  %s55_s12 = sshll.u32 %s902_s3, 4  ;;  %s56_s12 = int_to_ptr.hbm [resolvable:$true] %s55_s12 }
   0xb   :  { %s47_s10 = sshll.u32 %s830_s9, 4  ;;  %s831_s13 = smov [#allocation8]   ;;  %s48_s10 = int_to_ptr.vmem [resolvable:$true] %s47_s10 }
   0xc   :  { %50 = dma.hbm_to_vmem [thread:$0]  %s46_s8, 48, %s48_s10, [#allocation6]  }
   0xd   :  { %s57_s14 = sshll.u32 %s831_s13, 4  ;;  %s58_s14 = int_to_ptr.vmem [resolvable:$true] %s57_s14 }
   0xe   :  { %63 = dma.hbm_to_vmem [thread:$0]  %s56_s12, 1024, %s58_s14, [#allocation9], %s828_s30, %s828_s30, %s829_s6  }
   0xf   :  { %816 = dma.done.wait [#allocation3], 128  }
  0x10   :  { %817 = vsyncadd [#allocation3], 4294967168 }
  0x11   :  { %818 = dma.done.wait [#allocation6], 3120  }
  0x12   :  { %819 = vsyncadd [#allocation6], 4294964176 }
  0x13   :  { %820 = dma.done.wait [#allocation9], 1024  }
  0x14   :  { %821 = vsyncadd [#allocation9], 4294966272  ;;  %v599_v0 = vld [vmem:[#allocation5 + $0xa8] sm:$0xf]  ;;  %v666_v1 = vld [vmem:[#allocation5 + $0xb0] sm:$0xf0] }
  0x15   :  { %v665_v2 = vld [vmem:[#allocation5 + $0xac] sm:$0xf]  ;;  %v600_v3 = vor.u32 %v666_v1, %v599_v0  ;;  %v601_v4 = vld [vmem:[#allocation5 + $0xb4] sm:$0xf0]  ;;  %v587_v5 = vld [vmem:[#allocation5 + $0x90] sm:$0xf] }
  0x16   :  { %v663_v6 = vld [vmem:[#allocation5 + $0x98] sm:$0xf0]  ;;  %v604_v7 = vor.u32 %v665_v2, %v601_v4  ;;  %v662_v8 = vld [vmem:[#allocation5 + $0x94] sm:$0xf]  ;;  %v589_v9 = vld [vmem:[#allocation5 + $0x9c] sm:$0xf0] }
  0x17   :  { %259 = vmatpush.bf16.msra.mxu0 %v600_v3  ;;  %v588_v10 = vor.u32 %v663_v6, %v587_v5  ;;  %v592_v11 = vor.u32 %v662_v8, %v589_v9  ;;  %v575_v12 = vld [vmem:[#allocation5 + $0x78] sm:$0xf]  ;;  %v660_v13 = vld [vmem:[#allocation5 + $0x80] sm:$0xf0]  ;;  %v659_v14 = vld [vmem:[#allocation5 + $0x7c] sm:$0xf] }
  0x18   :  { %273 = vmatpush.bf16.msra.mxu1 %v604_v7  ;;  %v577_v15 = vld [vmem:[#allocation5 + $0x84] sm:$0xf0]  ;;  %v576_v16 = vor.u32 %v660_v13, %v575_v12  ;;  %v563_v18 = vld [vmem:[#allocation5 + $0x60] sm:$0xf]  ;;  %v657_v19 = vld [vmem:[#allocation5 + $0x68] sm:$0xf0] }
  0x19   :  { %v580_v17 = vor.u32 %v659_v14, %v577_v15  ;;  %v656_v20 = vld [vmem:[#allocation5 + $0x64] sm:$0xf]  ;;  %v565_v21 = vld [vmem:[#allocation5 + $0x6c] sm:$0xf0]  ;;  %v564_v22 = vor.u32 %v657_v19, %v563_v18  ;;  %v551_v24 = vld [vmem:[#allocation5 + $0x48] sm:$0xf] }
  0x1a   :  { %v568_v23 = vor.u32 %v656_v20, %v565_v21  ;;  %v654_v25 = vld [vmem:[#allocation5 + $0x50] sm:$0xf0]  ;;  %v653_v26 = vld [vmem:[#allocation5 + $0x4c] sm:$0xf]  ;;  %v553_v27 = vld [vmem:[#allocation5 + $0x54] sm:$0xf0] }
  0x1b   :  { %260 = vmatpush.bf16.msra.mxu0 %v588_v10  ;;  %v552_v28 = vor.u32 %v654_v25, %v551_v24  ;;  %v556_v29 = vor.u32 %v653_v26, %v553_v27  ;;  %v539_v30 = vld [vmem:[#allocation5 + $0x30] sm:$0xf]  ;;  %v651_v31 = vld [vmem:[#allocation5 + $0x38] sm:$0xf0]  ;;  %v650_v32 = vld [vmem:[#allocation5 + $0x34] sm:$0xf] }
  0x1c   :  { %274 = vmatpush.bf16.msra.mxu1 %v592_v11  ;;  %v541_v33 = vld [vmem:[#allocation5 + $0x3c] sm:$0xf0]  ;;  %v540_v34 = vor.u32 %v651_v31, %v539_v30  ;;  %v527_v36 = vld [vmem:[#allocation5 + $0x18] sm:$0xf]  ;;  %v648_v37 = vld [vmem:[#allocation5 + $0x20] sm:$0xf0] }
  0x1d   :  { %v544_v35 = vor.u32 %v650_v32, %v541_v33  ;;  %v647_v38 = vld [vmem:[#allocation5 + $0x1c] sm:$0xf]  ;;  %v529_v39 = vld [vmem:[#allocation5 + $0x24] sm:$0xf0]  ;;  %v528_v40 = vor.u32 %v648_v37, %v527_v36  ;;  %v515_v42 = vld [vmem:[#allocation5] sm:$0xf] }
  0x1e   :  { %v532_v41 = vor.u32 %v647_v38, %v529_v39  ;;  %v645_v43 = vld [vmem:[#allocation5 + $0x8] sm:$0xf0]  ;;  %v644_v44 = vld [vmem:[#allocation5 + $0x4] sm:$0xf]  ;;  %v517_v45 = vld [vmem:[#allocation5 + $0xc] sm:$0xf0] }
  0x1f   :  { %261 = vmatpush.bf16.msra.mxu0 %v576_v16  ;;  %v516_v46 = vor.u32 %v645_v43, %v515_v42  ;;  %v520_v47 = vor.u32 %v644_v44, %v517_v45  ;;  %v877_v48 = vld [vmem:[#allocation2] sm:$0xff]  ;;  %v881_v49 = vld [vmem:[#allocation7] sm:$0x7]  ;;  %v607_v0 = vld [vmem:[#allocation5 + $0xb0] sm:$0xf]  ;;  %vm356_vm0 = vcmask 64512  }
  0x20   :  { %275 = vmatpush.bf16.msra.mxu1 %v580_v17  ;;  %v119_v50 = vperm.slane %v881_v49, 0  ;;  %v120_v51 = vperm.slane %v881_v49, 1  ;;  %v667_v1 = vld [vmem:[#allocation5 + $0xb8] sm:$0xf0]  ;;  %v595_v2 = vld [vmem:[#allocation5 + $0x98] sm:$0xf] }
  0x21   :  { %v608_v3 = vor.u32 %v667_v1, %v607_v0  ;;  %v664_v4 = vld [vmem:[#allocation5 + $0xa0] sm:$0xf0]  ;;  %v583_v6 = vld [vmem:[#allocation5 + $0x80] sm:$0xf]  ;;  %v661_v7 = vld [vmem:[#allocation5 + $0x88] sm:$0xf0] }
  0x22   :  { %v596_v5 = vor.u32 %v664_v4, %v595_v2  ;;  %v584_v8 = vor.u32 %v661_v7, %v583_v6  ;;  %v571_v10 = vld [vmem:[#allocation5 + $0x68] sm:$0xf]  ;;  %v658_v11 = vld [vmem:[#allocation5 + $0x70] sm:$0xf0]  ;;  %v559_v15 = vld [vmem:[#allocation5 + $0x50] sm:$0xf] }
  0x23   :  { %262 = vmatpush.bf16.msra.mxu0 %v564_v22  ;;  %287 = vmatpush.bf16.msra.mxu2 %v608_v3  ;;  %v572_v14 = vor.u32 %v658_v11, %v571_v10  ;;  %v655_v16 = vld [vmem:[#allocation5 + $0x58] sm:$0xf0]  ;;  %v547_v19 = vld [vmem:[#allocation5 + $0x38] sm:$0xf]  ;;  %v652_v20 = vld [vmem:[#allocation5 + $0x40] sm:$0xf0] }
  0x24   :  { %276 = vmatpush.bf16.msra.mxu1 %v568_v23  ;;  %v560_v17 = vor.u32 %v655_v16, %v559_v15  ;;  %v548_v21 = vor.u32 %v652_v20, %v547_v19  ;;  %v535_v22 = vld [vmem:[#allocation5 + $0x20] sm:$0xf]  ;;  %v649_v23 = vld [vmem:[#allocation5 + $0x28] sm:$0xf0]  ;;  %v523_v26 = vld [vmem:[#allocation5 + $0x8] sm:$0xf] }
  0x25   :  { %v536_v24 = vor.u32 %v649_v23, %v535_v22  ;;  %v646_v27 = vld [vmem:[#allocation5 + $0x10] sm:$0xf0]  ;;  %v121_v42 = vperm.slane %v881_v49, 2  ;;  %vm384_vm1 = vcmask 1043456   ;;  %v672_v49 = vld [vmem:[#allocation8 + $0x20] sm:$0xff]  ;;  %v669_v1 = vld [vmem:[#allocation8 + $0x8] sm:$0xff] }
  0x26   :  { %v524_v30 = vor.u32 %v646_v27, %v523_v26  ;;  %v670_v0 = vld [vmem:[#allocation8 + $0x10] sm:$0xff]  ;;  %v668_v2 = vld [vmem:[#allocation8] sm:$0xff]  ;;  %s832_s15 = smov [#allocation10]   ;;  %s494_s19 = sshll.u32 %s904_s5, 4  ;;  %s495_s19 = int_to_ptr.hbm [resolvable:$true] %s494_s19 }
  0x27   :  { %263 = vmatpush.bf16.msra.mxu0 %v552_v28  ;;  %288 = vmatpush.bf16.msra.mxu2 %v596_v5  ;;  %s492_s16 = sshll.u32 %s832_s15, 4  ;;  %s833_s20 = smov 128   ;;  %s493_s16 = int_to_ptr.vmem [resolvable:$true] %s492_s16 }
  0x28   :  { %277 = vmatpush.bf16.msra.mxu1 %v556_v29  ;;  %s834_s21 = smov 8  }
  0x2b   :  { %264 = vmatpush.bf16.msra.mxu0 %v540_v34  ;;  %289 = vmatpush.bf16.msra.mxu2 %v584_v8  ;;  %v687_v8 = vld [vmem:[%s903_s4] ss:$0 sm:$0xff] }
  0x2c   :  { %278 = vmatpush.bf16.msra.mxu1 %v544_v35 }
  0x2f   :  { %265 = vmatpush.bf16.msra.mxu0 %v528_v40  ;;  %290 = vmatpush.bf16.msra.mxu2 %v572_v14 }
  0x30   :  { %279 = vmatpush.bf16.msra.mxu1 %v532_v41 }
  0x33   :  { %266 = vmatpush.bf16.msra.mxu0 %v516_v46  ;;  %291 = vmatpush.bf16.msra.mxu2 %v560_v17 }
  0x34   :  { %280 = vmatpush.bf16.msra.mxu1 %v520_v47 }
  0x36   :  { %267 = vmatmul.bf16.vlgmr.msra.gmra.mxu0 %v877_v48 }
  0x37   :  { %281 = vmatmul.bf16.vlgmr.msra.gmra.mxu1 %v877_v48  ;;  %292 = vmatpush.bf16.msra.mxu2 %v548_v21 }
  0x3b   :  { %293 = vmatpush.bf16.msra.mxu2 %v536_v24 }
  0x3f   :  { %294 = vmatpush.bf16.msra.mxu2 %v524_v30 }
  0x42   :  { %295 = vmatmul.bf16.vlgmr.msra.gmra.mxu2 %v877_v48 }
  0xb3   :  { %v268_v52 = vpop.f32.mrf.mxu0 }
  0xb4   :  { %v269_v53 = vadd.f32 %v268_v52, %v119_v50  ;;  %v282_v54 = vpop.f32.mrf.mxu1  ;;  %v675_v52 = vld [vmem:[#allocation8 + $0x38] sm:$0xff] }
  0xb5   :  { %v283_v55 = vadd.f32 %v282_v54, %v120_v51  ;;  %472 = vmatpush.bf16.msrb.mxu1 %v675_v52 }
  0xb7   :  { %v301_v56 = vpack.c.bf16 %v283_v55, %v269_v53  ;;  %v674_v53 = vld [vmem:[#allocation8 + $0x30] sm:$0xff]  ;;  %v673_v55 = vld [vmem:[#allocation8 + $0x28] sm:$0xff] }
  0xb9   :  { %v324_v57 = vrot.slane %v301_v56, 4  ;;  %473 = vmatpush.bf16.msrb.mxu1 %v674_v53 }
  0xbb   :  { %335 = vmatpush.bf16.xpose.msra.mxu3 %v324_v57  ;;  %v270_v58 = vpop.f32.mrf.mxu0 }
  0xbc   :  { %v271_v59 = vadd.f32 %v270_v58, %v119_v50  ;;  %v284_v60 = vpop.f32.mrf.mxu1 }
  0xbd   :  { %v285_v61 = vadd.f32 %v284_v60, %v120_v51  ;;  %474 = vmatpush.bf16.msrb.mxu1 %v673_v55 }
  0xbf   :  { %v303_v62 = vpack.c.bf16 %v285_v61, %v271_v59  ;;  %v671_v59 = vld [vmem:[#allocation8 + $0x18] sm:$0xff] }
  0xc1   :  { %v325_v63 = vrot.slane %v303_v62, 4  ;;  %475 = vmatpush.bf16.msrb.mxu1 %v672_v49 }
  0xc2   :  { %336 = vmatmul.bf16.vlgmr.msra.gmra.mxu3 %v301_v56 }
  0xc3   :  { %348 = vmatpush.bf16.xpose.msrb.mxu3 %v325_v63 }
  0xc5   :  { %v296_v43 = vpop.f32.mrf.mxu2  ;;  %476 = vmatpush.bf16.msrb.mxu1 %v671_v59 }
  0xc6   :  { %v297_v44 = vadd.f32 %v296_v43, %v121_v42 }
  0xc8   :  { %v302_v45 = vpack.c.bf16 %v297_v44, %v297_v44 }
  0xc9   :  { %477 = vmatpush.bf16.msrb.mxu1 %v670_v0 }
  0xca   :  { %v386_v46 = vsel %vm384_vm1, %v302_v45, 0 }
  0xcb   :  { %395 = vmatpush.bf16.msra.mxu3 %v386_v46 }
  0xcd   :  { %v298_v47 = vpop.f32.mrf.mxu2  ;;  %478 = vmatpush.bf16.msrb.mxu1 %v669_v1 }
  0xce   :  { %v299_v48 = vadd.f32 %v298_v47, %v121_v42 }
  0xd0   :  { %v304_v50 = vpack.c.bf16 %v299_v48, %v299_v48 }
  0xd1   :  { %479 = vmatpush.bf16.msrb.mxu1 %v668_v2 }
  0xd2   :  { %349 = vmatmul.bf16.vlgmr.msrb.gmra.mxu3 %v303_v62  ;;  %v405_v51 = vsel %vm384_vm1, %v304_v50, 0 }
  0xd3   :  { %414 = vmatpush.bf16.msrb.mxu0 %v405_v51 }
 0x145   :  { %v337_v9 = vpop.f32.mrf.mxu3 }
 0x146   :  { %v354_v12 = vmul.f32 0.088388346, %v337_v9 }
 0x148   :  { %v357_v13 = vsel %vm356_vm0, %v354_v12, -inf }
 0x149   :  { %358 = vmax.xlane.f32.xlu0 %v357_v13 }
 0x14d   :  { %v339_v18 = vpop.f32.mrf.mxu3 }
 0x155   :  { %v350_v25 = vpop.f32.mrf.mxu3 }
 0x156   :  { %v355_v28 = vmul.f32 0.088388346, %v350_v25 }
 0x158   :  { %v360_v29 = vsel %vm356_vm0, %v355_v28, -inf }
 0x159   :  { %361 = vmax.xlane.f32.xlu0 %v360_v29 }
 0x15d   :  { %v352_v31 = vpop.f32.mrf.mxu3 }
 0x1bc   :  { %v359_v32 = vpop.xlane.xlu0 %358 }
 0x1bd   :  { %v363_v33 = vsub.f32 %v354_v12, %v359_v32 }
 0x1bf   :  { %v365_v34 = vmul.f32 1.442695, %v363_v33 }
 0x1c1   :  { %688 = vpow2.f32 %v365_v34 }
 0x1c7   :  { %v689_v35 = vpop.eup %688 }
 0x1c8   :  { %v369_v36 = vsel %vm356_vm0, %v689_v35, 0.0 }
 0x1c9   :  { %370 = vadd.xlane.f32.xlu1 %v369_v36 }
 0x1cc   :  { %v362_v37 = vpop.xlane.xlu0 %361 }
 0x1cd   :  { %v364_v38 = vsub.f32 %v355_v28, %v362_v37 }
 0x1cf   :  { %v367_v39 = vmul.f32 1.442695, %v364_v38 }
 0x1d1   :  { %690 = vpow2.f32 %v367_v39 }
 0x1d7   :  { %v691_v40 = vpop.eup %690 }
 0x1d8   :  { %v372_v41 = vsel %vm356_vm0, %v691_v40, 0.0 }
 0x1d9   :  { %373 = vadd.xlane.f32.xlu1 %v372_v41 }
 0x23c   :  { %v371_v54 = vpop.xlane.xlu1 %370 }
 0x23d   :  { %692 = vrcp.f32 %v371_v54 }
 0x243   :  { %v693_v56 = vpop.eup %692 }
 0x244   :  { %v377_v57 = vmul.f32 %v693_v56, %v689_v35 }
 0x246   :  { %v379_v58 = vpack.c.bf16 %v377_v57, %v377_v57 }
 0x248   :  { %609 = vmatmul.msk.bf16.vlgmr.msra.gmra.mxu3 %vm356_vm0, %v379_v58 }
 0x24c   :  { %v374_v60 = vpop.xlane.xlu1 %373 }
 0x24d   :  { %694 = vrcp.f32 %v374_v60 }
 0x253   :  { %v695_v61 = vpop.eup %694 }
 0x254   :  { %v378_v62 = vmul.f32 %v695_v61, %v691_v40 }
 0x256   :  { %v380_v63 = vpack.c.bf16 %v378_v62, %v378_v62 }
 0x258   :  { %610 = vmatmul.msk.bf16.vlgmr.msrb.gmra.mxu0 %vm356_vm0, %v380_v63 }
 0x2cb   :  { %v397_v3 = vpop.f32.mrf.mxu3 }
 0x2d3   :  { %v399_v4 = vpop.f32.mrf.mxu3 }
 0x2d5   :  { %v416_v5 = vpop.f32.mrf.mxu0 }
 0x2d6   :  { %v420_v6 = vpack.c.bf16 %v416_v5, %v397_v3 }
 0x2d8   :  { %480 = vmatmul.bf16.vlgmr.msrb.gmra.mxu1 %v420_v6 }
 0x2dd   :  { %v418_v7 = vpop.f32.mrf.mxu0 }
 0x355   :  { %v481_v9 = vpop.f32.mrf.mxu1 }
 0x356   :  { %v482_v10 = vadd.f32 %v687_v8, %v481_v9 }
 0x358   :  { %486 = vst [vmem:[#allocation10] sm:$0xff] %v482_v10 }
 0x35d   :  { %v483_v11 = vpop.f32.mrf.mxu1 }
 0x35e   :  { %v484_v12 = vadd.f32 %v687_v8, %v483_v11 }
 0x360   :  { %487 = vst [vmem:[#allocation10 + $0x8] sm:$0xff] %v484_v12 }
 0x361   :  { %500 = dma.vmem_to_hbm [thread:$0]  %s493_s16, 256, %s495_s19, [#allocation4], %s833_s20, %s833_s20, %s834_s21  }
 0x362   :  { %822 = dma.done.wait [#allocation4], 256  }
 0x363   :  { %823 = vsyncadd [#allocation4], 4294967040 }
 0x364   :  { %505 = vsyncpa [#allocation3], 1 }
 0x365   :  { %506 = vsyncpa [#allocation6], 1 }
 0x366   :  { %507 = vsyncpa [#allocation9], 1 }
 0x367   :  { %508 = vsyncpa [#allocation4], 1 }

</bundles_post_ra>
